<compile_context>
chip_gen: v7x
topology: tpu7x:2x2x1
jax: 0.10.0
libtpu: 0.0.40
codegen_flags: <defaults>
</compile_context>

<pallas_src>
import functools

import jax
import jax.numpy as jnp
import numpy as np
from jax import lax
from jax.experimental import pallas as pl
from jax.experimental.pallas import tpu as pltpu

LANE = 128                      # lane width of a vreg
_VMEM_LIMIT = 32 * 1024 * 1024  # explicit scoped-VMEM limit (safe on v5e/v6e/v7x)


def _pick_col_tile(size: int, dim: int, target_block_bytes: int = 2 * 1024 * 1024) -> int:
    """Largest multiple-of-128 column tile dividing `size`, ~target_block_bytes per block.

    With double-buffered in+out blocks (4 buffers) this stays <= 8 MiB of VMEM, well
    under the scoped defaults on every chip.  The tile is also capped at size//2 so
    the grid keeps >= 2 steps and v7x megacore sharding of this mem-bound kernel
    remains possible.
    """
    assert size % LANE == 0, "memory bank size must be a multiple of 128"
    cap = max(LANE, target_block_bytes // (4 * max(dim, 1)))
    cap = min(cap, size)
    if size >= 2 * LANE:
        cap = min(cap, size // 2)
    tile = LANE
    c = LANE
    while c <= cap:
        if size % c == 0:
            tile = c
        c += LANE
    return tile


# ---------------------------------------------------------------------------
# Kernel 1: column-wise L2 normalization   bank[:, j] /= max(||bank[:, j]||, eps)
# ---------------------------------------------------------------------------
def _normalize_kernel(x_ref, o_ref):
    x = x_ref[...]                                     # (dim, tile)
    sumsq = jnp.sum(x * x, axis=0, keepdims=True)      # (1, tile)  -- XLU reduce
    # 1 / max(||x||, 1e-12) == rsqrt(max(sumsq, 1e-24)): single EUP op, no divide.
    inv = lax.rsqrt(jnp.maximum(sumsq, 1e-24))
    o_ref[...] = x * inv                               # cheap VPU broadcast-multiply


def normalize_columns(bank):
    dim, size = bank.shape
    tile = _pick_col_tile(size, dim)
    return pl.pallas_call(
        _normalize_kernel,
        out_shape=jax.ShapeDtypeStruct((dim, size), bank.dtype),
        grid=(size // tile,),
        in_specs=[pl.BlockSpec((dim, tile), lambda t: (0, t))],
        out_specs=pl.BlockSpec((dim, tile), lambda t: (0, t)),
        compiler_params=pltpu.CompilerParams(
            dimension_semantics=("parallel",),
            vmem_limit_bytes=_VMEM_LIMIT,
        ),
    )(bank)


# ---------------------------------------------------------------------------
# Kernel 2: dequeue-and-enqueue (only the tiles overlapping [ptr, ptr+n_write))
#   n_write = min(batch, size - ptr)
#   bank[:, ptr:ptr+n_write] = batch[:n_write].T ; everything else untouched.
# ---------------------------------------------------------------------------
def _enqueue_kernel(ptr_ref, slab_ref, bank_ref, out_ref, *,
                    bank_size, batch_size, tile, num_tiles):
    t = pl.program_id(0)
    ptr = ptr_ref[0]
    first = ptr // tile
    # Must match the index_maps: clamp so trailing grid steps revisit the last tile
    # (writes are recomputed identically, so the revisit is idempotent).
    tile_idx = jnp.minimum(first + t, num_tiles - 1)
    col_base = tile_idx * tile
    n_write = jnp.minimum(jnp.int32(batch_size), jnp.int32(bank_size) - ptr)

    # (1, tile) lane mask, broadcast over dim by the select — no (dim, tile) iotas.
    cols = col_base + lax.broadcasted_iota(jnp.int32, (1, tile), 1)
    in_window = jnp.logical_and(cols >= ptr, cols < ptr + n_write)

    # slab_ref already holds the batch columns pre-shifted to this tile's lanes, so
    # the copy is bit-exact and needs no MXU / one-hot / roll.
    out_ref[...] = jnp.where(in_window, slab_ref[...], bank_ref[...])


def dequeue_and_enqueue(bank, batch, ptr):
    dim, size = bank.shape
    bs = batch.shape[0]
    assert size % LANE == 0, "memory bank size must be a multiple of 128"
    # 256-wide tiles fill the 256-wide v6e/v7x datapaths and halve the grid steps of
    # this latency-dominated kernel; fall back to 128 if size (or VMEM budget: 6
    # double-buffered blocks of dim*tile*4 B) does not allow it.
    tile = 256 if (size % 256 == 0 and 6 * dim * 256 * 4 <= 24 * 1024 * 1024) else LANE
    num_tiles = size // tile
    # A write window of <= bs columns touches at most cdiv(bs, tile) + 1 tiles.
    grid_len = min(pl.cdiv(bs, tile) + 1, num_tiles)
    slab_cols = (grid_len + 1) * tile   # +1 tile absorbs the unused batch tail

    ptr_s = jnp.asarray(ptr, dtype=jnp.int32).reshape((1,))
    off = ptr_s[0] % tile
    w = min(bs, size)                   # rows that could ever be written (static)

    # Stage batch[:w].T at lane offset `off` (one XLA transpose + dynamic_update_slice)
    # so bank tile (first + t) reads slab tile t directly — all dynamic alignment is
    # resolved here, the Pallas kernel is a pure masked merge.
    slab = jnp.zeros((dim, slab_cols), dtype=bank.dtype)
    slab = lax.dynamic_update_slice(
        slab, batch[:w].T.astype(bank.dtype), (jnp.int32(0), off))

    kernel = functools.partial(
        _enqueue_kernel, bank_size=size, batch_size=bs, tile=tile, num_tiles=num_tiles
    )

    def slab_map(t, ptr_ref):
        first = ptr_ref[0] // tile
        tile_idx = jnp.minimum(first + t, num_tiles - 1)
        return (0, tile_idx - first)    # consistent under trailing-step clamping

    def bank_in_map(t, ptr_ref):
        p = ptr_ref[0]
        first = p // tile
        tile_idx = jnp.minimum(first + t, num_tiles - 1)
        col_base = tile_idx * tile
        n_write = jnp.minimum(jnp.int32(bs), jnp.int32(size) - p)
        fully = jnp.logical_and(col_base >= p, col_base + tile <= p + n_write)
        # Fully-overwritten interior tiles re-use the already-resident first tile
        # (values are unused by the select) -> their bank HBM read is skipped.
        return (0, jnp.where(fully, first, tile_idx))

    def bank_out_map(t, ptr_ref):
        first = ptr_ref[0] // tile
        return (0, jnp.minimum(first + t, num_tiles - 1))

    return pl.pallas_call(
        kernel,
        out_shape=jax.ShapeDtypeStruct((dim, size), bank.dtype),
        grid_spec=pltpu.PrefetchScalarGridSpec(
            num_scalar_prefetch=1,
            grid=(grid_len,),
            in_specs=[
                pl.BlockSpec((dim, tile), slab_map),     # staged batch columns
                pl.BlockSpec((dim, tile), bank_in_map),  # only edge tiles really read
            ],
            out_specs=pl.BlockSpec((dim, tile), bank_out_map),
        ),
        # bank (call-arg index 2, counting the scalar-prefetch arg) aliases output 0:
        # untouched bank columns are never re-DMA'd or re-written.
        input_output_aliases={2: 0},
        compiler_params=pltpu.CompilerParams(
            dimension_semantics=("arbitrary",),
            vmem_limit_bytes=_VMEM_LIMIT,
        ),
    )(ptr_s, slab, bank)


# ---------------------------------------------------------------------------
# Module wrapper (state held functionally in Python attributes)
# ---------------------------------------------------------------------------
class MemoryBankModule:
    def __init__(self, size: int = 2 ** 16):
        if size < 0:
            raise ValueError(f"Illegal memory bank size {size}, must be non-negative.")
        self.size = size
        self.bank = None       # lazily initialized, shape (dim, size)
        self.bank_ptr = None   # shape (1,), int32

    def _init_memory_bank(self, dim: int):
        # TODO(synk): optionally fuse RNG + normalization into one Pallas kernel
        # (pltpu.prng_seed / stateful_normal) to save one full HBM round-trip at init.
        key = jax.random.PRNGKey(0)
        bank = jax.random.normal(key, (dim, self.size), dtype=jnp.float32)
        self.bank = normalize_columns(bank)
        self.bank_ptr = jnp.zeros((1,), dtype=jnp.int32)

    def forward(self, output, labels=None, update: bool = False):
        if self.size == 0:
            return output, None
        _, dim = output.shape
        if self.bank is None:
            self._init_memory_bank(dim)
        if update:
            # Explicit snapshot copy (mirrors torch's .clone()): the aliased/donated
            # in-place enqueue can then never invalidate or mutate the returned bank.
            bank_snapshot = jnp.copy(self.bank)
            ptr = self.bank_ptr[0]
            batch_size = output.shape[0]
            self.bank = dequeue_and_enqueue(self.bank, output, self.bank_ptr)
            new_ptr = jnp.where(ptr + batch_size >= self.size, 0, ptr + batch_size)
            self.bank_ptr = new_ptr.astype(jnp.int32).reshape((1,))
        else:
            bank_snapshot = self.bank  # immutable in JAX, no copy needed
        return output, bank_snapshot

    __call__ = forward


# ---------------------------------------------------------------------------
# Pure-numpy reference for verification
# ---------------------------------------------------------------------------
def _ref_normalize(bank):
    norm = np.maximum(np.sqrt((bank * bank).sum(axis=0, keepdims=True)), 1e-12)
    return bank / norm


def _ref_enqueue(bank, batch, ptr):
    bank = bank.copy()
    size = bank.shape[1]
    bs = batch.shape[0]
    if ptr + bs >= size:
        bank[:, ptr:] = batch[: size - ptr].T
        new_ptr = 0
    else:
        bank[:, ptr: ptr + bs] = batch.T
        new_ptr = ptr + bs
    return bank, new_ptr


if __name__ == "__main__":
    # Small shapes: batch=8 keys of dim=32, memory bank holds size=512 keys
    # (2 column tiles of 256 -> exercises multi-tile + cross-tile paths).
    batch, dim, size = 8, 32, 512
    key = jax.random.PRNGKey(0)
    k_out, k_big = jax.random.split(key)
    output = jax.random.normal(k_out, (batch, dim), dtype=jnp.float32)

    mb = MemoryBankModule(size=size)

    # first call: initializes + returns the normalized bank, then enqueues `output`
    out0, bank0 = mb.forward(output, update=True)
    # second call: snapshot should already contain the first batch at columns [0, 8)
    out1, bank1 = mb.forward(output, update=True)
    jax.block_until_ready((out0, bank0, out1, bank1, mb.bank, mb.bank_ptr))

    # --- verify against numpy reference ---
    bank_init_ref = _ref_normalize(
        np.asarray(jax.random.normal(jax.random.PRNGKey(0), (dim, size), dtype=jnp.float32))
    )
    assert np.allclose(np.asarray(bank0), bank_init_ref, rtol=1e-5, atol=1e-5)

    bank_after1_ref, ptr1_ref = _ref_enqueue(bank_init_ref, np.asarray(output), 0)
    assert np.allclose(np.asarray(bank1), bank_after1_ref, rtol=1e-5, atol=1e-5)

    bank_after2_ref, ptr2_ref = _ref_enqueue(bank_after1_ref, np.asarray(output), ptr1_ref)
    assert np.allclose(np.asarray(mb.bank), bank_after2_ref, rtol=1e-5, atol=1e-5)
    assert int(mb.bank_ptr[0]) == ptr2_ref
    assert np.allclose(np.asarray(out1), np.asarray(output))

    # --- unaligned write that crosses the 256-column tile boundary (ptr=250) ---
    ptr_x = jnp.array([250], dtype=jnp.int32)
    bank_x = jax.block_until_ready(dequeue_and_enqueue(mb.bank, output, ptr_x))
    ref_x, _ = _ref_enqueue(np.asarray(mb.bank), np.asarray(output), 250)
    assert np.allclose(np.asarray(bank_x), ref_x)

    # --- tail / partial write (only 4 columns left before wrap) ---
    ptr_tail = jnp.array([size - 4], dtype=jnp.int32)
    bank_tail = jax.block_until_ready(dequeue_and_enqueue(mb.bank, output, ptr_tail))
    ref_tail, _ = _ref_enqueue(np.asarray(mb.bank), np.asarray(output), size - 4)
    assert np.allclose(np.asarray(bank_tail), ref_tail)

    # --- large batch: tile 0 fully overwritten (exercises the skipped bank read),
    #     tile 1 partially written ---
    big = jax.random.normal(k_big, (300, dim), dtype=jnp.float32)
    ptr0 = jnp.array([0], dtype=jnp.int32)
    bank_big = jax.block_until_ready(dequeue_and_enqueue(mb.bank, big, ptr0))
    ref_big, _ = _ref_enqueue(np.asarray(mb.bank), np.asarray(big), 0)
    assert np.allclose(np.asarray(bank_big), ref_big)

    print("KERNEL_OK")
</pallas_src>

<mosaic_0001>
module attributes {stable_mosaic.version = 11 : i64} {
  func.func @_normalize_kernel(%arg0: i32, %arg1: memref<32x256xf32, #tpu.memory_space<vmem>>, %arg2: memref<32x256xf32, #tpu.memory_space<vmem>>) attributes {dimension_semantics = [#tpu.dimension_semantics<parallel>], iteration_bounds = array<i64: 2>, scalar_prefetch = 0 : i64, scratch_operands = 0 : i64, tpu.core_type = #tpu.core_type<tc>, window_params = [{transform_indices = @transform_0, window_bounds = array<i64: 32, 256>}, {transform_indices = @transform_1, window_bounds = array<i64: 32, 256>}]} {
    %c0 = arith.constant 0 : index
    %c0_0 = arith.constant 0 : index
    %0 = vector.load %arg1[%c0, %c0_0] : memref<32x256xf32, #tpu.memory_space<vmem>>, vector<32x256xf32>
    %1 = arith.mulf %0, %0 : vector<32x256xf32>
    %cst = arith.constant dense<0.000000e+00> : vector<256xf32>
    %2 = vector.multi_reduction <add>, %1, %cst [0] : vector<32x256xf32> to vector<256xf32>
    %3 = vector.shape_cast %2 : vector<256xf32> to vector<1x256xf32>
    %cst_1 = arith.constant 1.000000e-24 : f32
    %4 = vector.broadcast %cst_1 : f32 to vector<1x256xf32>
    %5 = arith.maximumf %3, %4 : vector<1x256xf32>
    %6 = math.rsqrt %5 : vector<1x256xf32>
    %7 = vector.broadcast %6 : vector<1x256xf32> to vector<32x256xf32>
    %8 = arith.mulf %0, %7 : vector<32x256xf32>
    %c0_2 = arith.constant 0 : index
    %c0_3 = arith.constant 0 : index
    %9 = vector.load %arg2[%c0_2, %c0_3] : memref<32x256xf32, #tpu.memory_space<vmem>>, vector<32x256xf32>
    tpu.vector_store %arg2[%c0_2, %c0_3], %8 {strides = array<i32>} : memref<32x256xf32, #tpu.memory_space<vmem>>, vector<32x256xf32>,
    return
  }
  func.func @transform_0(%arg0: i32) -> (i32, i32) {
    %c0_i32 = arith.constant 0 : i32
    %c0_i32_0 = arith.constant 0 : i32
    return %c0_i32, %arg0 : i32, i32
  }
  func.func @transform_1(%arg0: i32) -> (i32, i32) {
    %c0_i32 = arith.constant 0 : i32
    %c0_i32_0 = arith.constant 0 : i32
    return %c0_i32, %arg0 : i32, i32
  }
}

</mosaic_0001>

<bundles_post_ra>
// kernel: tpu_custom_call.1
= control target key start
LH: loop header
LB: loop body
LE: loop exit
PB: predicated region body
PF: predicated region fallthrough
CT: control target
= control target key end

     0   :  { %6 = vsyncpa [#allocation3], 0  ;;  %s634_s0 = inlined_call_operand.hbm [shape: f32[32,512], index: 0, kind: input, shape index: {}]   ;;  %s635_s1 = inlined_call_operand.hbm [shape: f32[32,512], index: 1, kind: output, shape index: {}]  }
   0x1   :  { %8 = vsyncpa [#allocation3 + $0x1], 0 }
   0x2   :  { %9 = vsyncpa [#allocation4], 0 }
   0x3   :  { %11 = vsyncpa [#allocation4 + $0x1], 0  ;;  %s466_s6 = smov 0   ;;  %s468_s7 = smov 0  }
   0x4   :  { %s470_s8 = smov 0   ;;  %s472_s9 = smov 0  }
   0x5 LB: > { %s487_s10 = sadd.s32 4294967295, %s446_s9   ;;  %s278_s11 = sadd.s32 4294967294, %s446_s9   ;;  %s446_s9 = sphi %s472_s9, %s649_s9   ;;  %s442_s8 = sphi %s470_s8, %s648_s8   ;;  %s438_s7 = sphi %s468_s7, %s647_s7   ;;  %s434_s6 = sphi %s466_s6, %s646_s6  }
   0x6   : > { %s491_s12 = sadd.s32 1, %s446_s9   ;;  %s24_s13 = sadd.s32 1, %s442_s8 }
   0x7   : > { %s21_s14 = ssub.s32 %s446_s9, %s491_s12  ;;  %p31_p0 = scmp.ne.s32.totalorder %s442_s8, %s438_s7 }
   0x8   : > { %p22_p1 = scmp.eq.s32.totalorder %s21_s14, 0  ;;  %p32_p2 = scmp.eq.s32.totalorder %s446_s9, 0 }
   0x9   : > { %p37_p3 = scmp.ne.s32.totalorder %s438_s7, %s434_s6  ;;  %p38_p4 = scmp.eq.s32.totalorder %s487_s10, 0 }
   0xa   : > { %s503_s15 = scalar_select %p22_p1, %s442_s8, %s24_s13  }
   0xb   : > { %p505_p5 = por %p32_p2, %p31_p0  ;;  %p509_p6 = por %p38_p4, %p37_p3 }
   0xc   : > { %p61_p7 = scmp.eq.s32.totalorder %s487_s10, 1  ;;  %p67_p8 = scmp.eq.s32.totalorder %s278_s11, 1 }
   0xd   : > { %p306_p10 = scmp.lt.s32.totalorder %s446_s9, 2  ;;  %s87_s20 = sand.u32 1, %s442_s8  }
   0xe   : > { %p516_p11 = por %p61_p7, %p31_p0  ;;  %p520_p12 = por %p67_p8, %p37_p3 }
   0xf   : > { %s292_s21 = sshll.u32 %s446_s9, 8  ;;  %s281_s22 = sshll.u32 %s87_s20, 6 }
  0x10   : > { %s639_s18 = scalar_select %p516_p11, 1, 0 }
  0x11   : > { %s640_s19 = scalar_select %p520_p12, 1, 0 }
  0x12   : > { %s529_s25 = scalar_lea.hbm %s634_s0, %s292_s21  ;;  %s91_s26 = scalar_lea.vmem [#allocation2], %s281_s22 }
  0x13   : > { %s98_s27 = sshll.u32 %s91_s26, 4  ;;  %p533_p13 = pnand %p306_p10, %p505_p5  ;;  %s537_s27 = int_to_ptr.vmem [resolvable:$true] %s98_s27 }
  0x14   : > { %s540_s29 = scalar_lea.sflag [#allocation3], %s87_s20  ;;  %s350_s30 = scalar_lea.hbm %s529_s25, 1024 }
  0x15   : > { %p351_p1 = scmp.ne.s32.totalorder %s529_s25, %s350_s30  ;;  %p352_p2 = pneg %p533_p13 }
  0x16   : > { %s355_s4 = scalar_lea.hbm %s634_s0, 2048  ;;  %p356_p5 = scmp.lt.u32.totalorder %s529_s25, %s634_s0 }
  0x17   : > { %p353_p3 = pnand %p352_p2, %p351_p1  ;;  %p357_p7 = scmp.lt.u32.totalorder %s355_s4, %s350_s30 }
  0x18   : > { %p359_p10 = scmp.lt.u32.totalorder %s350_s30, %s529_s25 }
  0x19   : > { %p354_p4 = pneg %p353_p3  ;;  %p358_p8 = por %p357_p7, %p356_p5 }
  0x1b   : > { %p360_p9 = por %p359_p10, %p358_p8 }
  0x1d   : > { %p361_p0 = pnand %p360_p9, %p354_p4 }
  0x1f   : > { %364 = shalt.err (!%p361_p0)
}
  0x20   : > { %s365_s13 = scalar_lea.vmem %s537_s27, 1024  ;;  %s448_s14 = smov [#allocation2]  }
  0x21   : > { %p366_p1 = scmp.ne.s32.totalorder %s537_s27, %s365_s13  ;;  %s370_s16 = sshll.u32 %s448_s14, 4  ;;  %s371_s16 = int_to_ptr.vmem [resolvable:$false] %s370_s16 }
  0x22   : > { %s372_s20 = scalar_lea.vmem %s371_s16, 2048  ;;  %p373_p11 = scmp.lt.s32.totalorder %s537_s27, %s371_s16 }
  0x23   : > { %p368_p3 = pnand %p366_p1, %p352_p2  ;;  %p374_p5 = scmp.lt.s32.totalorder %s372_s20, %s365_s13 }
  0x25   : > { %p369_p12 = pneg %p368_p3  ;;  %p375_p7 = por %p374_p5, %p373_p11 }
  0x27   : > { %p376_p8 = pnand %p375_p7, %p369_p12 }
  0x29   : > { %379 = shalt.err (!%p376_p8)
}
  0x2a   : > { %s449_s21 = smov 512   ;;  %s450_s22 = smov 256  }
  0x2b   : > { %s451_s23 = smov 16   ;;  %p106_p9 = scmp.lt.s32.totalorder %s446_s9, 3 }
  0x2c   : > { %301 = dma.hbm_to_vmem [thread:$0]  (!%p533_p13), %s529_s25, 1024, %s537_s27, %s540_s29, %s449_s21, %s450_s22, %s451_s23  }
  0x2d   : > { %p642_p0 = scmp.ge.s32.totalorder %s446_s9, 1 }
  0x2f   : > { %p107_p2 = pnand %p642_p0, %p106_p9 }
  0x30   : > { %s572_s24 = sand.u32 (!%p107_p2), 1, %s438_s7  }
  0x31   : > { %110 = sbr.rel (%p107_p2) target bundleno = 113 (0x71), region = 24  ;;  %s285_s26 = sshll.u32 (!%p107_p2), %s572_s24, 6 }
  0x32   : > { %s113_s30 = scalar_lea.sflag (!%p107_p2), [#allocation3], %s572_s24  ;;  %s116_s2 = scalar_lea.vmem (!%p107_p2), [#allocation2], %s285_s26 }
  0x38   : > { %425 = dma.done.wait (%p509_p6), %s113_s30, 1024  }
  0x39   : > { %427 = vsyncadd (%p509_p6), %s113_s30, 4294966272  ;;  %v137_v0 = vld [vmem:[%s116_s2] sm:$0xff]  ;;  %v139_v1 = vld [vmem:[%s116_s2 + $0x10] sm:$0xff]  ;;  %s134_s17 = scalar_lea.vmem [#allocation5], %s285_s26  ;;  %s293_s27 = sshll.u32 %s487_s10, 8 }
  0x3a   : > { %v141_v2 = vld [vmem:[%s116_s2 + $0x20] sm:$0xff]  ;;  %v143_v3 = vld [vmem:[%s116_s2 + $0x30] sm:$0xff]  ;;  %v145_v4 = vmul.f32 %v137_v0, %v137_v0  ;;  %v147_v5 = vmul.f32 %v139_v1, %v139_v1  ;;  %v138_v7 = vld [vmem:[%s116_s2 + $0x8] sm:$0xff]  ;;  %s205_s25 = sshll.u32 %s134_s17, 4  ;;  %s590_s3 = scalar_lea.hbm %s635_s1, %s293_s27  ;;  %s585_s25 = int_to_ptr.vmem [resolvable:$true] %s205_s25 }
  0x3b   : > { %v149_v6 = vmul.f32 %v141_v2, %v141_v2  ;;  %v140_v8 = vld [vmem:[%s116_s2 + $0x18] sm:$0xff]  ;;  %v142_v9 = vld [vmem:[%s116_s2 + $0x28] sm:$0xff]  ;;  %v146_v11 = vmul.f32 %v138_v7, %v138_v7  ;;  %v151_v13 = vmul.f32 %v143_v3, %v143_v3  ;;  %s192_s10 = scalar_lea.sflag [#allocation4], %s572_s24  ;;  %s380_s4 = scalar_lea.vmem %s585_s25, 1024 }
  0x3c   : > { %v144_v10 = vld [vmem:[%s116_s2 + $0x38] sm:$0xff]  ;;  %v148_v12 = vmul.f32 %v140_v8, %v140_v8  ;;  %v153_v14 = vadd.f32 %v147_v5, %v145_v4  ;;  %v150_v15 = vmul.f32 %v142_v9, %v142_v9  ;;  %p381_p6 = scmp.ne.s32.totalorder %s585_s25, %s380_s4  ;;  %p643_p11 = scmp.ne.s32.totalorder %s639_s18, 0 }
  0x3d   : > { %v152_v16 = vmul.f32 %v144_v10, %v144_v10  ;;  %s452_s5 = smov [#allocation5]  }
  0x3e   : > { %v162_v17 = vadd.f32 %v148_v12, %v146_v11  ;;  %v154_v18 = vadd.f32 %v153_v14, %v149_v6  ;;  %p382_p12 = pnand %p381_p6, %p643_p11  ;;  %s384_s11 = sshll.u32 %s452_s5, 4  ;;  %s385_s11 = int_to_ptr.vmem [resolvable:$false] %s384_s11 }
  0x3f   : > { %s386_s13 = scalar_lea.vmem %s385_s11, 2048  ;;  %p387_p4 = scmp.lt.s32.totalorder %s585_s25, %s385_s11 }
  0x40   : > { %v163_v19 = vadd.f32 %v162_v17, %v150_v15  ;;  %v155_v20 = vadd.f32 %v154_v18, %v151_v13  ;;  %p383_p13 = pneg %p382_p12  ;;  %p388_p10 = scmp.lt.s32.totalorder %s386_s13, %s380_s4 }
  0x42   : > { %v164_v21 = vadd.f32 %v163_v19, %v152_v16  ;;  %v156_v22 = vrot.slane %v155_v20, 4  ;;  %p389_p1 = por %p388_p10, %p387_p4 }
  0x44   : > { %v165_v23 = vrot.slane %v164_v21, 4  ;;  %v157_v24 = vadd.f32 %v156_v22, %v155_v20  ;;  %p390_p3 = pnand %p389_p1, %p383_p13 }
  0x46   : > { %v166_v25 = vadd.f32 %v165_v23, %v164_v21  ;;  %v158_v26 = vrot.slane %v157_v24, 2 }
  0x48   : > { %v167_v27 = vrot.slane %v166_v25, 2  ;;  %v159_v28 = vadd.f32 %v158_v26, %v157_v24 }
  0x4a   : > { %v168_v29 = vadd.f32 %v167_v27, %v166_v25  ;;  %v160_v30 = vrot.slane %v159_v28, 1 }
  0x4c   : > { %v169_v31 = vrot.slane %v168_v29, 1  ;;  %v161_v32 = vadd.f32 %v160_v30, %v159_v28 }
  0x4e   : > { %v170_v33 = vadd.f32 %v169_v31, %v168_v29  ;;  %v171_v34 = vmax.f32 %v161_v32, 1e-24 }
  0x50   : > { %v172_v35 = vmax.f32 %v170_v33, 1e-24  ;;  %346 = vrsqrt.f32 %v171_v34 }
  0x52   : > { %348 = vrsqrt.f32 %v172_v35 }
  0x5a   : > { %v347_v36 = vpop.eup %346 }
  0x5b   : > { %v175_v38 = vmul.f32 %v347_v36, %v137_v0  ;;  %v177_v39 = vmul.f32 %v347_v36, %v139_v1  ;;  %v179_v40 = vmul.f32 %v347_v36, %v141_v2  ;;  %v181_v41 = vmul.f32 %v347_v36, %v143_v3 }
  0x5c   : > { %v349_v37 = vpop.eup %348 }
  0x5d   : > { %v176_v42 = vmul.f32 %v349_v37, %v138_v7  ;;  %v178_v43 = vmul.f32 %v349_v37, %v140_v8  ;;  %v180_v44 = vmul.f32 %v349_v37, %v142_v9  ;;  %v182_v45 = vmul.f32 %v349_v37, %v144_v10  ;;  %183 = vst [vmem:[%s134_s17] sm:$0xff] %v175_v38 }
  0x5e   : > { %185 = vst [vmem:[%s134_s17 + $0x10] sm:$0xff] %v177_v39  ;;  %187 = vst [vmem:[%s134_s17 + $0x20] sm:$0xff] %v179_v40 }
  0x5f   : > { %189 = vst [vmem:[%s134_s17 + $0x30] sm:$0xff] %v181_v41  ;;  %184 = vst [vmem:[%s134_s17 + $0x8] sm:$0xff] %v176_v42 }
  0x60   : > { %186 = vst [vmem:[%s134_s17 + $0x18] sm:$0xff] %v178_v43  ;;  %188 = vst [vmem:[%s134_s17 + $0x28] sm:$0xff] %v180_v44 }
  0x61   : > { %190 = vst [vmem:[%s134_s17 + $0x38] sm:$0xff] %v182_v45 }
  0x62   : > { %393 = shalt.err (!%p390_p3)
}
  0x63   : > { %s394_s14 = scalar_lea.hbm %s590_s3, 1024  ;;  %s398_s21 = scalar_lea.hbm %s635_s1, 2048 }
  0x64   : > { %p395_p5 = scmp.ne.s32.totalorder %s590_s3, %s394_s14  ;;  %p399_p9 = scmp.lt.u32.totalorder %s590_s3, %s635_s1 }
  0x65   : > { %p400_p0 = scmp.lt.u32.totalorder %s398_s21, %s394_s14  ;;  %p402_p6 = scmp.lt.u32.totalorder %s394_s14, %s590_s3 }
  0x66   : > { %p396_p7 = pnand %p395_p5, %p643_p11 }
  0x67   : > { %p401_p2 = por %p400_p0, %p399_p9 }
  0x68   : > { %p397_p8 = pneg %p396_p7 }
  0x69   : > { %p403_p12 = por %p402_p6, %p401_p2 }
  0x6b   : > { %p404_p13 = pnand %p403_p12, %p397_p8 }
  0x6d   : > { %407 = shalt.err (!%p404_p13)
}
  0x6e   : > { %s453_s26 = smov 256   ;;  %s454_s30 = smov 512  }
  0x6f   : > { %s455_s2 = smov 16  }
  0x70   : > { %296 = dma.vmem_to_hbm [thread:$0]  (%p643_p11), %s585_s25, 1024, %s590_s3, %s192_s10, %s453_s26, %s454_s30, %s455_s2  }
  0x71 PF: > { %s220_s17 = sand.u32 1, %s434_s6   ;;  %p644_p4 = scmp.ne.s32.totalorder %s640_s19, 0 }
  0x72   : > { %p645_p10 = scmp.ge.s32.totalorder %s446_s9, 2  ;;  %s221_s27 = scalar_lea.sflag [#allocation4], %s220_s17 }
  0x74   : > { %p303_p1 = pnand %p645_p10, %p644_p4 }
  0x76   : > { %429 = dma.done.wait (!%p303_p1), %s221_s27, 1024  }
  0x77   : > { %431 = vsyncadd (!%p303_p1), %s221_s27, 4294966272  ;;  %p14_p3 = scmp.ge.s32.totalorder %s491_s12, 4   ;;  %s646_s6 = smov %s438_s7 }
  0x78   : > { %s647_s7 = smov %s442_s8  ;;  %s648_s8 = smov %s503_s15 }
  0x79   : > { %s649_s9 = smov %s491_s12  ;;  %16 = sbr.rel (!%p14_p3) target bundleno = 5 (0x5), region = 69 }
  0x80   :  { %226 = vsyncpa [#allocation3], 1 }
  0x81   :  { %228 = vsyncpa [#allocation3 + $0x1], 1 }
  0x82   :  { %229 = vsyncpa [#allocation4], 1 }
  0x83   :  { %231 = vsyncpa [#allocation4 + $0x1], 1 }

</bundles_post_ra>
